<compile_context>
chip_gen: v7x
topology: tpu7x:2x2x1
jax: 0.10.0
libtpu: 0.0.40
codegen_flags: <defaults>
</compile_context>

<pallas_src>
import functools
import math

import jax
import jax.numpy as jnp
import numpy as np
from jax import lax
from jax.experimental import pallas as pl
from jax.experimental.pallas import tpu as pltpu

IN_FEATURES = 2
HIDDEN = 10
LANE = 128            # TPU lane width
DROPOUT_P = 0.5       # nn.Dropout() default
BIG_NEG = -1e30       # "-inf" for padded logit columns (finite -> no NaNs)
_KEEP_THRESHOLD = min(int((1.0 - DROPOUT_P) * 2**32), 2**32 - 1)


def _round_up(x, m):
    return ((x + m - 1) // m) * m


def _choose_batch_tile(batch, c_pad):
    """Largest power-of-two batch tile <= 512 whose double-buffered x+out tiles
    stay well under the scoped-VMEM default (sized for v7x's 64 MiB VMEM)."""
    tb = 512
    while tb > 8 and 2 * tb * (LANE + c_pad) * 4 > (8 << 20):
        tb //= 2
    if batch < tb:
        tb = _round_up(batch, 8)
    return tb


def _net2_kernel(seed_ref, x_ref, hid_ref, wf_ref, bf_ref, o_ref, *, training):
    tb = x_ref.shape[0]
    x = x_ref[...]                                    # (TB, 128) f32; cols >= 2 are zero

    # ---- layer1: Linear(2, 10) + tanh.  K=2 -> two VPU broadcast-FMAs. ----
    h1 = jnp.tanh(x[:, 0:1] * hid_ref[0:1, :]
                  + x[:, 1:2] * hid_ref[1:2, :]
                  + hid_ref[12:13, :])                # (TB, 128); cols >= 10 stay 0

    # ---- layer2: Linear(10, 10) + tanh.  K=10 -> unrolled VPU FMAs. ----
    acc = hid_ref[13:14, :]                           # b2, (1, 128)
    for k in range(HIDDEN):
        acc = acc + h1[:, k:k + 1] * hid_ref[2 + k:3 + k, :]
    h2 = jnp.tanh(acc)                                # (TB, 128); cols >= 10 stay 0

    # ---- Dropout(p=0.5), train-mode semantics (inverted dropout). ----
    if training:
        rows = lax.broadcasted_iota(jnp.int32, (tb, LANE), 0)
        cols = lax.broadcasted_iota(jnp.int32, (tb, LANE), 1)
        gidx = (pl.program_id(0) * tb + rows) * LANE + cols   # unique per element
        h = (gidx.astype(jnp.uint32)
             + seed_ref[0].astype(jnp.uint32) * jnp.uint32(0x9E3779B9))
        # murmur3-style finalizer (wrapping uint32 arithmetic, VPU-only)
        h = h ^ (h >> jnp.uint32(16))
        h = h * jnp.uint32(0x85EBCA6B)
        h = h ^ (h >> jnp.uint32(13))
        h = h * jnp.uint32(0xC2B2AE35)
        h = h ^ (h >> jnp.uint32(16))
        keep = (h < jnp.uint32(_KEEP_THRESHOLD)).astype(jnp.float32)
        h2 = h2 * keep * jnp.float32(1.0 / (1.0 - DROPOUT_P))

    # ---- fc + log_softmax(dim=-1); padded class columns carry bias -1e30. ----
    logits = (jnp.dot(h2, wf_ref[...], preferred_element_type=jnp.float32)
              + bf_ref[...])
    m = jnp.max(logits, axis=-1, keepdims=True)
    lse = m + jnp.log(jnp.sum(jnp.exp(logits - m), axis=-1, keepdims=True))
    o_ref[...] = (logits - lse).astype(o_ref.dtype)


def pack_params(params, num_classes):
    """Pad / transpose PyTorch-layout params into the kernel's lane-aligned layout."""
    w1, b1, w2, b2, wf, bf = params          # torch shapes: (10,2),(10,),(10,10),(10,),(C,10),(C,)
    c_pad = _round_up(num_classes, LANE)
    # One resident (16, 128) slab for both hidden layers:
    #   rows 0:2 -> W1^T, rows 2:12 -> W2^T, row 12 -> b1, row 13 -> b2, rest 0.
    hid = jnp.zeros((16, LANE), jnp.float32)
    hid = hid.at[0:IN_FEATURES, :HIDDEN].set(w1.T)
    hid = hid.at[2:2 + HIDDEN, :HIDDEN].set(w2.T)
    hid = hid.at[12, :HIDDEN].set(b1)
    hid = hid.at[13, :HIDDEN].set(b2)
    wf_p = jnp.zeros((LANE, c_pad), jnp.float32).at[:HIDDEN, :num_classes].set(wf.T)
    # Padded class columns get a huge negative bias so exp(.) == 0 in the softmax.
    bf_p = jnp.full((1, c_pad), BIG_NEG, jnp.float32).at[0, :num_classes].set(bf)
    return hid, wf_p, bf_p


def net2_forward(x, params, seed, *, num_classes, training=True):
    batch = x.shape[0]
    hid, wf_p, bf_p = pack_params(params, num_classes)
    c_pad = wf_p.shape[1]
    tb = _choose_batch_tile(batch, c_pad)
    b_pad = _round_up(batch, tb)

    x_p = jnp.zeros((b_pad, LANE), jnp.float32)
    x_p = x_p.at[:batch, :IN_FEATURES].set(x.astype(jnp.float32))
    seed_arr = jnp.asarray([seed], dtype=jnp.int32)

    kern = functools.partial(_net2_kernel, training=training)

    cost = pl.CostEstimate(
        flops=2 * batch * (IN_FEATURES * HIDDEN + HIDDEN * HIDDEN
                           + HIDDEN * num_classes),
        transcendentals=batch * (2 * HIDDEN + num_classes),
        bytes_accessed=4 * (b_pad * LANE + b_pad * c_pad
                            + 16 * LANE + LANE * c_pad + c_pad),
    )

    out = pl.pallas_call(
        kern,
        out_shape=jax.ShapeDtypeStruct((b_pad, c_pad), jnp.float32),
        grid=(b_pad // tb,),
        in_specs=[
            pl.BlockSpec(memory_space=pltpu.MemorySpace.SMEM),   # seed scalar
            pl.BlockSpec((tb, LANE), lambda i: (i, 0)),          # x batch tile
            pl.BlockSpec((16, LANE), lambda i: (0, 0)),          # hidden-layer slab (resident)
            pl.BlockSpec((LANE, c_pad), lambda i: (0, 0)),       # fc weight (resident)
            pl.BlockSpec((1, c_pad), lambda i: (0, 0)),          # fc bias (resident)
        ],
        out_specs=pl.BlockSpec((tb, c_pad), lambda i: (i, 0)),
        compiler_params=pltpu.CompilerParams(
            dimension_semantics=("parallel",)),
        cost_estimate=cost,
    )(seed_arr, x_p, hid, wf_p, bf_p)

    return out[:batch, :num_classes]


def init_params(key, num_classes):
    """PyTorch-style Linear init, PyTorch layout: weight (out, in), bias (out,)."""
    ks = jax.random.split(key, 6)

    def linear(kw, kb, fan_in, fan_out):
        bound = 1.0 / math.sqrt(fan_in)
        w = jax.random.uniform(kw, (fan_out, fan_in), jnp.float32, -bound, bound)
        b = jax.random.uniform(kb, (fan_out,), jnp.float32, -bound, bound)
        return w, b

    w1, b1 = linear(ks[0], ks[1], IN_FEATURES, HIDDEN)
    w2, b2 = linear(ks[2], ks[3], HIDDEN, HIDDEN)
    wf, bf = linear(ks[4], ks[5], HIDDEN, num_classes)
    return (w1, b1, w2, b2, wf, bf)


def net2_reference(x, params):
    """Pure-JAX eval-mode reference (dropout is identity in eval)."""
    w1, b1, w2, b2, wf, bf = params
    hp = jax.lax.Precision.HIGHEST
    h1 = jnp.tanh(jnp.dot(x, w1.T, precision=hp) + b1)
    h2 = jnp.tanh(jnp.dot(h1, w2.T, precision=hp) + b2)
    logits = jnp.dot(h2, wf.T, precision=hp) + bf
    return jax.nn.log_softmax(logits, axis=-1)


if __name__ == "__main__":
    key = jax.random.PRNGKey(0)
    k_param, k_x = jax.random.split(key)

    batch = 6                # not a multiple of 8 -> exercises batch padding
    num_classes = 1000       # module default; padded to 1024 lanes in the kernel

    params = init_params(k_param, num_classes)
    x = jax.random.normal(k_x, (batch, IN_FEATURES), jnp.float32)

    # Eval mode (dropout off) must match the pure-JAX reference.
    out_eval = net2_forward(x, params, seed=0, num_classes=num_classes, training=False)
    out_eval = jax.block_until_ready(out_eval)
    ref_eval = net2_reference(x, params)
    assert out_eval.shape == (batch, num_classes)
    assert np.allclose(np.asarray(out_eval), np.asarray(ref_eval),
                       atol=1e-3, rtol=1e-3)

    # Train mode: dropout on; rows must still be valid log-probabilities.
    out_train = net2_forward(x, params, seed=123, num_classes=num_classes, training=True)
    out_train = jax.block_until_ready(out_train)
    row_sums = np.asarray(jnp.exp(out_train).sum(axis=-1))
    assert out_train.shape == (batch, num_classes)
    assert np.isfinite(np.asarray(out_train)).all()
    assert np.allclose(row_sums, 1.0, atol=1e-4), row_sums

    print("KERNEL_OK")
</pallas_src>

<mosaic_0001>
module attributes {stable_mosaic.version = 11 : i64} {
  func.func @_net2_kernel(%arg0: i32, %arg1: memref<1xi32, #tpu.memory_space<smem>>, %arg2: memref<8x128xf32, #tpu.memory_space<vmem>>, %arg3: memref<16x128xf32, #tpu.memory_space<vmem>>, %arg4: memref<128x1024xf32, #tpu.memory_space<vmem>>, %arg5: memref<1x1024xf32, #tpu.memory_space<vmem>>, %arg6: memref<8x1024xf32, #tpu.memory_space<vmem>>) attributes {dimension_semantics = [#tpu.dimension_semantics<parallel>], iteration_bounds = array<i64: 1>, scalar_prefetch = 0 : i64, scratch_operands = 0 : i64, tpu.core_type = #tpu.core_type<tc>, window_params = [{transform_indices = @transform_0, window_bounds = array<i64: 1>}, {transform_indices = @transform_1, window_bounds = array<i64: 8, 128>}, {pipeline_mode = #tpu.pipeline_mode<synchronous>, transform_indices = @transform_2, window_bounds = array<i64: 16, 128>}, {pipeline_mode = #tpu.pipeline_mode<synchronous>, transform_indices = @transform_3, window_bounds = array<i64: 128, 1024>}, {pipeline_mode = #tpu.pipeline_mode<synchronous>, transform_indices = @transform_4, window_bounds = array<i64: 1, 1024>}, {transform_indices = @transform_5, window_bounds = array<i64: 8, 1024>}]} {
    %c0 = arith.constant 0 : index
    %c0_0 = arith.constant 0 : index
    %0 = vector.load %arg2[%c0, %c0_0] : memref<8x128xf32, #tpu.memory_space<vmem>>, vector<8x128xf32>
    %1 = vector.extract_strided_slice %0 {offsets = [0, 0], sizes = [8, 1], strides = [1, 1]} : vector<8x128xf32> to vector<8x1xf32>
    %c0_1 = arith.constant 0 : index
    %c0_2 = arith.constant 0 : index
    %2 = vector.load %arg3[%c0_1, %c0_2] : memref<16x128xf32, #tpu.memory_space<vmem>>, vector<1x128xf32>
    %3 = vector.broadcast %1 : vector<8x1xf32> to vector<8x128xf32>
    %4 = vector.broadcast %2 : vector<1x128xf32> to vector<8x128xf32>
    %5 = arith.mulf %3, %4 : vector<8x128xf32>
    %6 = vector.extract_strided_slice %0 {offsets = [0, 1], sizes = [8, 1], strides = [1, 1]} : vector<8x128xf32> to vector<8x1xf32>
    %c1 = arith.constant 1 : index
    %c0_3 = arith.constant 0 : index
    %7 = vector.load %arg3[%c1, %c0_3] : memref<16x128xf32, #tpu.memory_space<vmem>>, vector<1x128xf32>
    %8 = vector.broadcast %6 : vector<8x1xf32> to vector<8x128xf32>
    %9 = vector.broadcast %7 : vector<1x128xf32> to vector<8x128xf32>
    %10 = arith.mulf %8, %9 : vector<8x128xf32>
    %11 = arith.addf %5, %10 : vector<8x128xf32>
    %c12 = arith.constant 12 : index
    %c0_4 = arith.constant 0 : index
    %12 = vector.load %arg3[%c12, %c0_4] : memref<16x128xf32, #tpu.memory_space<vmem>>, vector<1x128xf32>
    %13 = vector.broadcast %12 : vector<1x128xf32> to vector<8x128xf32>
    %14 = arith.addf %11, %13 : vector<8x128xf32>
    %15 = math.tanh %14 : vector<8x128xf32>
    %c13 = arith.constant 13 : index
    %c0_5 = arith.constant 0 : index
    %16 = vector.load %arg3[%c13, %c0_5] : memref<16x128xf32, #tpu.memory_space<vmem>>, vector<1x128xf32>
    %17 = vector.extract_strided_slice %15 {offsets = [0, 0], sizes = [8, 1], strides = [1, 1]} : vector<8x128xf32> to vector<8x1xf32>
    %c2 = arith.constant 2 : index
    %c0_6 = arith.constant 0 : index
    %18 = vector.load %arg3[%c2, %c0_6] : memref<16x128xf32, #tpu.memory_space<vmem>>, vector<1x128xf32>
    %19 = vector.broadcast %17 : vector<8x1xf32> to vector<8x128xf32>
    %20 = vector.broadcast %18 : vector<1x128xf32> to vector<8x128xf32>
    %21 = arith.mulf %19, %20 : vector<8x128xf32>
    %22 = vector.broadcast %16 : vector<1x128xf32> to vector<8x128xf32>
    %23 = arith.addf %22, %21 : vector<8x128xf32>
    %24 = vector.extract_strided_slice %15 {offsets = [0, 1], sizes = [8, 1], strides = [1, 1]} : vector<8x128xf32> to vector<8x1xf32>
    %c3 = arith.constant 3 : index
    %c0_7 = arith.constant 0 : index
    %25 = vector.load %arg3[%c3, %c0_7] : memref<16x128xf32, #tpu.memory_space<vmem>>, vector<1x128xf32>
    %26 = vector.broadcast %24 : vector<8x1xf32> to vector<8x128xf32>
    %27 = vector.broadcast %25 : vector<1x128xf32> to vector<8x128xf32>
    %28 = arith.mulf %26, %27 : vector<8x128xf32>
    %29 = arith.addf %23, %28 : vector<8x128xf32>
    %30 = vector.extract_strided_slice %15 {offsets = [0, 2], sizes = [8, 1], strides = [1, 1]} : vector<8x128xf32> to vector<8x1xf32>
    %c4 = arith.constant 4 : index
    %c0_8 = arith.constant 0 : index
    %31 = vector.load %arg3[%c4, %c0_8] : memref<16x128xf32, #tpu.memory_space<vmem>>, vector<1x128xf32>
    %32 = vector.broadcast %30 : vector<8x1xf32> to vector<8x128xf32>
    %33 = vector.broadcast %31 : vector<1x128xf32> to vector<8x128xf32>
    %34 = arith.mulf %32, %33 : vector<8x128xf32>
    %35 = arith.addf %29, %34 : vector<8x128xf32>
    %36 = vector.extract_strided_slice %15 {offsets = [0, 3], sizes = [8, 1], strides = [1, 1]} : vector<8x128xf32> to vector<8x1xf32>
    %c5 = arith.constant 5 : index
    %c0_9 = arith.constant 0 : index
    %37 = vector.load %arg3[%c5, %c0_9] : memref<16x128xf32, #tpu.memory_space<vmem>>, vector<1x128xf32>
    %38 = vector.broadcast %36 : vector<8x1xf32> to vector<8x128xf32>
    %39 = vector.broadcast %37 : vector<1x128xf32> to vector<8x128xf32>
    %40 = arith.mulf %38, %39 : vector<8x128xf32>
    %41 = arith.addf %35, %40 : vector<8x128xf32>
    %42 = vector.extract_strided_slice %15 {offsets = [0, 4], sizes = [8, 1], strides = [1, 1]} : vector<8x128xf32> to vector<8x1xf32>
    %c6 = arith.constant 6 : index
    %c0_10 = arith.constant 0 : index
    %43 = vector.load %arg3[%c6, %c0_10] : memref<16x128xf32, #tpu.memory_space<vmem>>, vector<1x128xf32>
    %44 = vector.broadcast %42 : vector<8x1xf32> to vector<8x128xf32>
    %45 = vector.broadcast %43 : vector<1x128xf32> to vector<8x128xf32>
    %46 = arith.mulf %44, %45 : vector<8x128xf32>
    %47 = arith.addf %41, %46 : vector<8x128xf32>
    %48 = vector.extract_strided_slice %15 {offsets = [0, 5], sizes = [8, 1], strides = [1, 1]} : vector<8x128xf32> to vector<8x1xf32>
    %c7 = arith.constant 7 : index
    %c0_11 = arith.constant 0 : index
    %49 = vector.load %arg3[%c7, %c0_11] : memref<16x128xf32, #tpu.memory_space<vmem>>, vector<1x128xf32>
    %50 = vector.broadcast %48 : vector<8x1xf32> to vector<8x128xf32>
    %51 = vector.broadcast %49 : vector<1x128xf32> to vector<8x128xf32>
    %52 = arith.mulf %50, %51 : vector<8x128xf32>
    %53 = arith.addf %47, %52 : vector<8x128xf32>
    %54 = vector.extract_strided_slice %15 {offsets = [0, 6], sizes = [8, 1], strides = [1, 1]} : vector<8x128xf32> to vector<8x1xf32>
    %c8 = arith.constant 8 : index
    %c0_12 = arith.constant 0 : index
    %55 = vector.load %arg3[%c8, %c0_12] : memref<16x128xf32, #tpu.memory_space<vmem>>, vector<1x128xf32>
    %56 = vector.broadcast %54 : vector<8x1xf32> to vector<8x128xf32>
    %57 = vector.broadcast %55 : vector<1x128xf32> to vector<8x128xf32>
    %58 = arith.mulf %56, %57 : vector<8x128xf32>
    %59 = arith.addf %53, %58 : vector<8x128xf32>
    %60 = vector.extract_strided_slice %15 {offsets = [0, 7], sizes = [8, 1], strides = [1, 1]} : vector<8x128xf32> to vector<8x1xf32>
    %c9 = arith.constant 9 : index
    %c0_13 = arith.constant 0 : index
    %61 = vector.load %arg3[%c9, %c0_13] : memref<16x128xf32, #tpu.memory_space<vmem>>, vector<1x128xf32>
    %62 = vector.broadcast %60 : vector<8x1xf32> to vector<8x128xf32>
    %63 = vector.broadcast %61 : vector<1x128xf32> to vector<8x128xf32>
    %64 = arith.mulf %62, %63 : vector<8x128xf32>
    %65 = arith.addf %59, %64 : vector<8x128xf32>
    %66 = vector.extract_strided_slice %15 {offsets = [0, 8], sizes = [8, 1], strides = [1, 1]} : vector<8x128xf32> to vector<8x1xf32>
    %c10 = arith.constant 10 : index
    %c0_14 = arith.constant 0 : index
    %67 = vector.load %arg3[%c10, %c0_14] : memref<16x128xf32, #tpu.memory_space<vmem>>, vector<1x128xf32>
    %68 = vector.broadcast %66 : vector<8x1xf32> to vector<8x128xf32>
    %69 = vector.broadcast %67 : vector<1x128xf32> to vector<8x128xf32>
    %70 = arith.mulf %68, %69 : vector<8x128xf32>
    %71 = arith.addf %65, %70 : vector<8x128xf32>
    %72 = vector.extract_strided_slice %15 {offsets = [0, 9], sizes = [8, 1], strides = [1, 1]} : vector<8x128xf32> to vector<8x1xf32>
    %c11 = arith.constant 11 : index
    %c0_15 = arith.constant 0 : index
    %73 = vector.load %arg3[%c11, %c0_15] : memref<16x128xf32, #tpu.memory_space<vmem>>, vector<1x128xf32>
    %74 = vector.broadcast %72 : vector<8x1xf32> to vector<8x128xf32>
    %75 = vector.broadcast %73 : vector<1x128xf32> to vector<8x128xf32>
    %76 = arith.mulf %74, %75 : vector<8x128xf32>
    %77 = arith.addf %71, %76 : vector<8x128xf32>
    %78 = math.tanh %77 : vector<8x128xf32>
    %c0_16 = arith.constant 0 : index
    %c0_17 = arith.constant 0 : index
    %79 = vector.load %arg4[%c0_16, %c0_17] : memref<128x1024xf32, #tpu.memory_space<vmem>>, vector<128x1024xf32>
    %cst = arith.constant dense<0.000000e+00> : vector<8x1024xf32>
    %80 = tpu.matmul %78, %79, %cst {dimension_numbers = #tpu.dot_dimension_numbers<[1], [0], [0], [1], [0, 0, 1, 1], [], []>} : vector<8x128xf32>, vector<128x1024xf32>, vector<8x1024xf32> -> vector<8x1024xf32>
    %c0_18 = arith.constant 0 : index
    %c0_19 = arith.constant 0 : index
    %81 = vector.load %arg5[%c0_18, %c0_19] : memref<1x1024xf32, #tpu.memory_space<vmem>>, vector<1x1024xf32>
    %82 = vector.broadcast %81 : vector<1x1024xf32> to vector<8x1024xf32>
    %83 = arith.addf %80, %82 : vector<8x1024xf32>
    %cst_20 = arith.constant dense<0xFF800000> : vector<8xf32>
    %84 = vector.multi_reduction <maximumf>, %83, %cst_20 [1] : vector<8x1024xf32> to vector<8xf32>
    %85 = vector.shape_cast %84 : vector<8xf32> to vector<8x1xf32>
    %86 = vector.broadcast %85 : vector<8x1xf32> to vector<8x1024xf32>
    %87 = arith.subf %83, %86 : vector<8x1024xf32>
    %88 = math.exp %87 : vector<8x1024xf32>
    %cst_21 = arith.constant dense<0.000000e+00> : vector<8xf32>
    %89 = vector.multi_reduction <add>, %88, %cst_21 [1] : vector<8x1024xf32> to vector<8xf32>
    %90 = vector.shape_cast %89 : vector<8xf32> to vector<8x1xf32>
    %91 = math.log %90 : vector<8x1xf32>
    %92 = arith.addf %85, %91 : vector<8x1xf32>
    %93 = vector.broadcast %92 : vector<8x1xf32> to vector<8x1024xf32>
    %94 = arith.subf %83, %93 : vector<8x1024xf32>
    %c0_22 = arith.constant 0 : index
    %c0_23 = arith.constant 0 : index
    %95 = vector.load %arg6[%c0_22, %c0_23] : memref<8x1024xf32, #tpu.memory_space<vmem>>, vector<8x1024xf32>
    tpu.vector_store %arg6[%c0_22, %c0_23], %94 {strides = array<i32>} : memref<8x1024xf32, #tpu.memory_space<vmem>>, vector<8x1024xf32>,
    return
  }
  func.func @transform_0(%arg0: i32) -> i32 {
    %c0_i32 = arith.constant 0 : i32
    %c0_i32_0 = arith.constant 0 : i32
    return %c0_i32 : i32
  }
  func.func @transform_1(%arg0: i32) -> (i32, i32) {
    %c0_i32 = arith.constant 0 : i32
    %c0_i32_0 = arith.constant 0 : i32
    return %arg0, %c0_i32 : i32, i32
  }
  func.func @transform_2(%arg0: i32) -> (i32, i32) {
    %c0_i32 = arith.constant 0 : i32
    %c0_i32_0 = arith.constant 0 : i32
    %c0_i32_1 = arith.constant 0 : i32
    return %c0_i32, %c0_i32_0 : i32, i32
  }
  func.func @transform_3(%arg0: i32) -> (i32, i32) {
    %c0_i32 = arith.constant 0 : i32
    %c0_i32_0 = arith.constant 0 : i32
    %c0_i32_1 = arith.constant 0 : i32
    return %c0_i32, %c0_i32_0 : i32, i32
  }
  func.func @transform_4(%arg0: i32) -> (i32, i32) {
    %c0_i32 = arith.constant 0 : i32
    %c0_i32_0 = arith.constant 0 : i32
    %c0_i32_1 = arith.constant 0 : i32
    return %c0_i32, %c0_i32_0 : i32, i32
  }
  func.func @transform_5(%arg0: i32) -> (i32, i32) {
    %c0_i32 = arith.constant 0 : i32
    %c0_i32_0 = arith.constant 0 : i32
    return %arg0, %c0_i32 : i32, i32
  }
}

</mosaic_0001>

<bundles_post_ra>
// kernel: tpu_custom_call.1
= control target key start
LH: loop header
LB: loop body
LE: loop exit
PB: predicated region body
PF: predicated region fallthrough
CT: control target
= control target key end

     0   :  { %11 = vsyncpa [#allocation4], 0  ;;  %s1190_s0 = inlined_call_operand.<no memory space> [shape: s32[1], index: 0, kind: input, shape index: {}]   ;;  %s1191_s1 = inlined_call_operand.hbm [shape: f32[8,128], index: 1, kind: input, shape index: {}]   ;;  %s1192_s2 = inlined_call_operand.hbm [shape: f32[16,128], index: 2, kind: input, shape index: {}]   ;;  %s1193_s3 = inlined_call_operand.hbm [shape: f32[128,1024], index: 3, kind: input, shape index: {}]   ;;  %s1194_s4 = inlined_call_operand.vmem [shape: f32[1,1024], index: 4, kind: input, shape index: {}]   ;;  %s1195_s5 = inlined_call_operand.hbm [shape: f32[8,1024], index: 5, kind: output, shape index: {}]  }
   0x1   :  { %12 = vsyncpa [#allocation7], 0 }
   0x2   :  { %13 = vsyncpa [#allocation5], 0  ;;  %s1028_s18 = smov [#allocation6]   ;;  %s934_s21 = scalar_lea.hbm %s1192_s2, 256 }
   0x3   :  { %s31_s0 = sshll.u32 %s1028_s18, 4  ;;  %p935_p0 = scmp.ne.s32.totalorder %s1192_s2, %s934_s21  ;;  %s32_s0 = int_to_ptr.vmem [resolvable:$true] %s31_s0 }
   0x4   :  { %p938_p1 = scmp.lt.u32.totalorder %s934_s21, %s1192_s2 }
   0x6   :  { %p940_p2 = pnand %p938_p1, %p935_p0 }
   0x8   :  { %943 = shalt.err (!%p940_p2)
}
   0x9   :  { %s944_s26 = scalar_lea.vmem %s32_s0, 256  ;;  %p949_p4 = scmp.lt.s32.totalorder %s32_s0, %s32_s0 }
   0xa   :  { %p945_p3 = scmp.ne.s32.totalorder %s32_s0, %s944_s26  ;;  %p950_p5 = scmp.lt.s32.totalorder %s944_s26, %s944_s26 }
   0xc   :  { %p951_p6 = por %p950_p5, %p949_p4 }
   0xe   :  { %p952_p7 = pnand %p951_p6, %p945_p3 }
  0x10   :  { %955 = shalt.err (!%p952_p7)
}
  0x11   :  { %s1029_s27 = smov 128   ;;  %s1030_s28 = smov 8  }
  0x12   :  { %37 = dma.hbm_to_vmem [thread:$0]  %s1192_s2, 256, %s32_s0, [#allocation7], %s1029_s27, %s1029_s27, %s1030_s28  }
  0x13   :  { %s1031_s6 = smov [#allocation3]   ;;  %s1032_s8 = smov [#allocation8]  }
  0x14   :  { %s22_s7 = sshll.u32 %s1031_s6, 4  ;;  %s43_s9 = sshll.u32 %s1032_s8, 4  ;;  %s23_s7 = int_to_ptr.vmem [resolvable:$true] %s22_s7  ;;  %s44_s9 = int_to_ptr.vmem [resolvable:$true] %s43_s9 }
  0x15   :  { %s956_s12 = scalar_lea.hbm %s1191_s1, 128 }
  0x16   :  { %p957_p8 = scmp.ne.s32.totalorder %s1191_s1, %s956_s12  ;;  %p960_p9 = scmp.lt.u32.totalorder %s956_s12, %s1191_s1 }
  0x18   :  { %p962_p10 = pnand %p960_p9, %p957_p8 }
  0x1a   :  { %965 = shalt.err (!%p962_p10)
}
  0x1b   :  { %s966_s2 = scalar_lea.vmem %s23_s7, 128  ;;  %p971_p12 = scmp.lt.s32.totalorder %s23_s7, %s23_s7 }
  0x1c   :  { %p967_p11 = scmp.ne.s32.totalorder %s23_s7, %s966_s2  ;;  %p972_p13 = scmp.lt.s32.totalorder %s966_s2, %s966_s2 }
  0x1e   :  { %p973_p0 = por %p972_p13, %p971_p12 }
  0x20   :  { %p974_p1 = pnand %p973_p0, %p967_p11 }
  0x22   :  { %977 = shalt.err (!%p974_p1)
}
  0x23   :  { %25 = dma.hbm_to_vmem [thread:$0]  %s1191_s1, 128, %s23_s7, [#allocation4]  }
  0x24   :  { %s978_s20 = scalar_lea.hbm %s1193_s3, 16384 }
  0x25   :  { %p979_p2 = scmp.ne.s32.totalorder %s1193_s3, %s978_s20  ;;  %p982_p3 = scmp.lt.u32.totalorder %s978_s20, %s1193_s3 }
  0x27   :  { %p984_p4 = pnand %p982_p3, %p979_p2 }
  0x29   :  { %987 = shalt.err (!%p984_p4)
}
  0x2a   :  { %s988_s25 = scalar_lea.vmem %s44_s9, 16384  ;;  %p993_p6 = scmp.lt.s32.totalorder %s44_s9, %s44_s9 }
  0x2b   :  { %p989_p5 = scmp.ne.s32.totalorder %s44_s9, %s988_s25  ;;  %p994_p7 = scmp.lt.s32.totalorder %s988_s25, %s988_s25 }
  0x2d   :  { %p995_p8 = por %p994_p7, %p993_p6 }
  0x2f   :  { %p996_p9 = pnand %p995_p8, %p989_p5 }
  0x31   :  { %999 = shalt.err (!%p996_p9)
}
  0x32   :  { %s1033_s1 = smov 1024   ;;  %s1034_s26 = smov 64  }
  0x33   :  { %49 = dma.hbm_to_vmem [thread:$0]  %s1193_s3, 16384, %s44_s9, [#allocation7], %s1033_s1, %s1033_s1, %s1034_s26  }
  0x34   :  { %1022 = dma.done.wait [#allocation4], 128  }
  0x35   :  { %1023 = vsyncadd [#allocation4], 4294967168 }
  0x36   :  { %1024 = dma.done.wait [#allocation7], 16640  }
  0x37   :  { %1025 = vsyncadd [#allocation7], 4294950656  ;;  %v1035_v0 = vmov 0   ;;  %v61_v1 = vld [vmem:[#allocation3] sm:$0xff]  ;;  %v1036_v2 = vmov 1   ;;  %v1037_v3 = vmov 3  }
  0x38   :  { %900 = vset.pattern.permute.xlu0 %v1035_v0  ;;  %902 = vset.pattern.permute.xlu1 %v1035_v0  ;;  %v739_v5 = vld [vmem:[#allocation6] ss:$0 sm:$0xff]  ;;  %v740_v6 = vld [vmem:[#allocation6 + $0x1] ss:$0 sm:$0xff]  ;;  %v741_v10 = vld [vmem:[#allocation6 + $0xc] ss:$0 sm:$0xff] }
  0x39   :  { %65 = vperm.xlu0 %900, %v61_v1   ;;  %v1038_v14 = vmov 6   ;;  %v1039_v15 = vmov 9   ;;  %v1040_v16 = vmov 2   ;;  %v209_v17 = vld [vmem:[#allocation8 + $0x8] sm:$0xff]  ;;  %v211_v19 = vld [vmem:[#allocation8 + $0x18] sm:$0xff]  ;;  %v208_v22 = vld [vmem:[#allocation8] sm:$0xff] }
  0x3a   :  { %v217_v18 = vld [vmem:[#allocation8 + $0x48] sm:$0xff]  ;;  %v219_v21 = vld [vmem:[#allocation8 + $0x58] sm:$0xff]  ;;  %v216_v23 = vld [vmem:[#allocation8 + $0x40] sm:$0xff]  ;;  %v1041_v28 = vmov 4   ;;  %v1042_v42 = vmov 5   ;;  %v1043_v58 = vmov 7  }
  0x3b   :  { %v753_v20 = vpack.c.bf16 %v217_v18, %v209_v17  ;;  %v785_v24 = vpack.c.bf16 %v219_v21, %v211_v19  ;;  %v755_v25 = vpack.c.bf16 %v216_v23, %v208_v22  ;;  %v210_v26 = vld [vmem:[#allocation8 + $0x10] sm:$0xff]  ;;  %v225_v30 = vld [vmem:[#allocation8 + $0x88] sm:$0xff]  ;;  %v227_v32 = vld [vmem:[#allocation8 + $0x98] sm:$0xff] }
  0x3c   :  { %v218_v27 = vld [vmem:[#allocation8 + $0x50] sm:$0xff]  ;;  %v233_v31 = vld [vmem:[#allocation8 + $0xc8] sm:$0xff]  ;;  %v235_v34 = vld [vmem:[#allocation8 + $0xd8] sm:$0xff] }
  0x3d   :  { %901 = vset.pattern.permute.xlu0 %v1036_v2  ;;  %754 = vmatprep.subr.bf16.mxu0 %v753_v20  ;;  %v787_v29 = vpack.c.bf16 %v218_v27, %v210_v26  ;;  %v757_v33 = vpack.c.bf16 %v233_v31, %v225_v30  ;;  %v224_v35 = vld [vmem:[#allocation8 + $0x80] sm:$0xff]  ;;  %v789_v37 = vpack.c.bf16 %v235_v34, %v227_v32  ;;  %v226_v39 = vld [vmem:[#allocation8 + $0x90] sm:$0xff]  ;;  %v241_v43 = vld [vmem:[#allocation8 + $0x108] sm:$0xff] }
  0x3e   :  { %75 = vperm.xlu0 %901, %v61_v1   ;;  %786 = vmatprep.subr.bf16.mxu1 %v785_v24  ;;  %v232_v36 = vld [vmem:[#allocation8 + $0xc0] sm:$0xff]  ;;  %v234_v40 = vld [vmem:[#allocation8 + $0xd0] sm:$0xff]  ;;  %v249_v44 = vld [vmem:[#allocation8 + $0x148] sm:$0xff] }
  0x3f   :  { %756 = vmatpush1.bf16.msra.mxu0 %v755_v25  ;;  %788 = vmatpush1.bf16.msra.mxu1 %v787_v29  ;;  %v759_v38 = vpack.c.bf16 %v232_v36, %v224_v35  ;;  %v791_v41 = vpack.c.bf16 %v234_v40, %v226_v39  ;;  %v243_v45 = vld [vmem:[#allocation8 + $0x118] sm:$0xff]  ;;  %v761_v46 = vpack.c.bf16 %v249_v44, %v241_v43  ;;  %v240_v48 = vld [vmem:[#allocation8 + $0x100] sm:$0xff]  ;;  %v242_v52 = vld [vmem:[#allocation8 + $0x110] sm:$0xff] }
  0x40   :  { %758 = vmatprep.subr.bf16.mxu0 %v757_v33  ;;  %790 = vmatprep.subr.bf16.mxu1 %v789_v37  ;;  %v251_v47 = vld [vmem:[#allocation8 + $0x158] sm:$0xff]  ;;  %v248_v49 = vld [vmem:[#allocation8 + $0x140] sm:$0xff]  ;;  %v250_v53 = vld [vmem:[#allocation8 + $0x150] sm:$0xff] }
  0x41   :  { %v793_v50 = vpack.c.bf16 %v251_v47, %v243_v45  ;;  %v763_v51 = vpack.c.bf16 %v248_v49, %v240_v48  ;;  %v795_v54 = vpack.c.bf16 %v250_v53, %v242_v52  ;;  %v257_v55 = vld [vmem:[#allocation8 + $0x188] sm:$0xff]  ;;  %v259_v57 = vld [vmem:[#allocation8 + $0x198] sm:$0xff]  ;;  %v256_v61 = vld [vmem:[#allocation8 + $0x180] sm:$0xff] }
  0x42   :  { %905 = vset.pattern.permute.xlu0 %v1037_v3  ;;  %v265_v56 = vld [vmem:[#allocation8 + $0x1c8] sm:$0xff]  ;;  %v267_v60 = vld [vmem:[#allocation8 + $0x1d8] sm:$0xff]  ;;  %v264_v63 = vld [vmem:[#allocation8 + $0x1c0] sm:$0xff] }
  0x43   :  { %760 = vmatpush1.bf16.msra.mxu0 %v759_v38  ;;  %792 = vmatpush1.bf16.msra.mxu1 %v791_v41  ;;  %v765_v59 = vpack.c.bf16 %v265_v56, %v257_v55  ;;  %v797_v62 = vpack.c.bf16 %v267_v60, %v259_v57  ;;  %v258_v0 = vld [vmem:[#allocation8 + $0x190] sm:$0xff]  ;;  %v289_v18 = vld [vmem:[#allocation8 + $0x288] sm:$0xff]  ;;  %v291_v20 = vld [vmem:[#allocation8 + $0x298] sm:$0xff]  ;;  %v1045_v41 = vmov 0.0  }
  0x44   :  { %762 = vmatprep.subr.bf16.mxu0 %v761_v46  ;;  %794 = vmatprep.subr.bf16.mxu1 %v793_v50  ;;  %v266_v1 = vld [vmem:[#allocation8 + $0x1d0] sm:$0xff]  ;;  %v297_v19 = vld [vmem:[#allocation8 + $0x2c8] sm:$0xff]  ;;  %v299_v22 = vld [vmem:[#allocation8 + $0x2d8] sm:$0xff] }
  0x45   :  { %v799_v3 = vpack.c.bf16 %v266_v1, %v258_v0  ;;  %v773_v21 = vpack.c.bf16 %v297_v19, %v289_v18  ;;  %v288_v23 = vld [vmem:[#allocation8 + $0x280] sm:$0xff]  ;;  %v805_v25 = vpack.c.bf16 %v299_v22, %v291_v20  ;;  %v290_v27 = vld [vmem:[#allocation8 + $0x290] sm:$0xff]  ;;  %v313_v30 = vld [vmem:[#allocation8 + $0x348] sm:$0xff]  ;;  %442 = vmatprep.mubr.f32.mxu0 %v1045_v41  ;;  %513 = vmatprep.mubr.f32.mxu1 %v1045_v41 }
  0x46   :  { %v296_v24 = vld [vmem:[#allocation8 + $0x2c0] sm:$0xff]  ;;  %v307_v31 = vld [vmem:[#allocation8 + $0x318] sm:$0xff]  ;;  %v306_v38 = vld [vmem:[#allocation8 + $0x310] sm:$0xff] }
  0x47   :  { %764 = vmatpush1.bf16.msra.mxu0 %v763_v51  ;;  %796 = vmatpush1.bf16.msra.mxu1 %v795_v54  ;;  %v775_v26 = vpack.c.bf16 %v296_v24, %v288_v23  ;;  %v315_v33 = vld [vmem:[#allocation8 + $0x358] sm:$0xff]  ;;  %v304_v34 = vld [vmem:[#allocation8 + $0x300] sm:$0xff]  ;;  %v314_v39 = vld [vmem:[#allocation8 + $0x350] sm:$0xff] }
  0x48   :  { %766 = vmatprep.subr.bf16.mxu0 %v765_v59  ;;  %798 = vmatprep.subr.bf16.mxu1 %v797_v62  ;;  %v312_v35 = vld [vmem:[#allocation8 + $0x340] sm:$0xff]  ;;  %v809_v36 = vpack.c.bf16 %v315_v33, %v307_v31  ;;  %v321_v40 = vld [vmem:[#allocation8 + $0x388] sm:$0xff]  ;;  %v323_v44 = vld [vmem:[#allocation8 + $0x398] sm:$0xff] }
  0x49   :  { %v779_v37 = vpack.c.bf16 %v312_v35, %v304_v34  ;;  %v329_v43 = vld [vmem:[#allocation8 + $0x3c8] sm:$0xff]  ;;  %v331_v45 = vld [vmem:[#allocation8 + $0x3d8] sm:$0xff]  ;;  %v320_v48 = vld [vmem:[#allocation8 + $0x380] sm:$0xff] }
  0x4a   :  { %v781_v46 = vpack.c.bf16 %v329_v43, %v321_v40  ;;  %v813_v47 = vpack.c.bf16 %v331_v45, %v323_v44  ;;  %v328_v49 = vld [vmem:[#allocation8 + $0x3c0] sm:$0xff]  ;;  %v322_v50 = vld [vmem:[#allocation8 + $0x390] sm:$0xff]  ;;  %v213_v53 = vld [vmem:[#allocation8 + $0x28] sm:$0xff] }
  0x4b   :  { %800 = vmatpush1.bf16.msra.mxu1 %v799_v3  ;;  %v783_v51 = vpack.c.bf16 %v328_v49, %v320_v48  ;;  %v330_v52 = vld [vmem:[#allocation8 + $0x3d0] sm:$0xff]  ;;  %v221_v54 = vld [vmem:[#allocation8 + $0x68] sm:$0xff]  ;;  %v215_v57 = vld [vmem:[#allocation8 + $0x38] sm:$0xff] }
  0x4c   :  { %v815_v55 = vpack.c.bf16 %v330_v52, %v322_v50  ;;  %v817_v56 = vpack.c.bf16 %v221_v54, %v213_v53  ;;  %v744_v62 = vld [vmem:[#allocation6 + $0x3] ss:$0 sm:$0xff]  ;;  %v743_v1 = vld [vmem:[#allocation6 + $0xd] ss:$0 sm:$0xff]  ;;  %v745_v3 = vld [vmem:[#allocation6 + $0x4] ss:$0 sm:$0xff] }
  0x4d   :  { %v750_v24 = vld [vmem:[#allocation6 + $0x9] ss:$0 sm:$0xff]  ;;  %v222_v40 = vld [vmem:[#allocation8 + $0x70] sm:$0xff]  ;;  %v237_v43 = vld [vmem:[#allocation8 + $0xe8] sm:$0xff] }
  0x4e   :  { %v231_v44 = vld [vmem:[#allocation8 + $0xb8] sm:$0xff]  ;;  %v228_v48 = vld [vmem:[#allocation8 + $0xa0] sm:$0xff]  ;;  %v230_v52 = vld [vmem:[#allocation8 + $0xb0] sm:$0xff] }
  0x4f   :  { %v239_v45 = vld [vmem:[#allocation8 + $0xf8] sm:$0xff]  ;;  %v236_v49 = vld [vmem:[#allocation8 + $0xe0] sm:$0xff]  ;;  %v238_v53 = vld [vmem:[#allocation8 + $0xf0] sm:$0xff] }
  0x50   :  { %v245_v54 = vld [vmem:[#allocation8 + $0x128] sm:$0xff] }
  0xb8   :  { %v66_v4 = vpop.permute.xlu0 %65 }
  0xb9   :  { %v72_v8 = vmul.f32 %v739_v5, %v66_v4  ;;  %v273_v4 = vld [vmem:[#allocation8 + $0x208] sm:$0xff] }
  0xba   :  { %v281_v5 = vld [vmem:[#allocation8 + $0x248] sm:$0xff] }
  0xbd   :  { %v76_v7 = vpop.permute.xlu0 %75 }
  0xbe   :  { %v82_v9 = vmul.f32 %v740_v6, %v76_v7  ;;  %v769_v6 = vpack.c.bf16 %v281_v5, %v273_v4  ;;  %v275_v7 = vld [vmem:[#allocation8 + $0x218] sm:$0xff] }
  0xc0   :  { %v83_v11 = vadd.f32 %v82_v9, %v72_v8  ;;  %v283_v8 = vld [vmem:[#allocation8 + $0x258] sm:$0xff]  ;;  %v272_v9 = vld [vmem:[#allocation8 + $0x200] sm:$0xff] }
  0xc2   :  { %v89_v12 = vadd.f32 %v741_v10, %v83_v11  ;;  %v1044_v10 = vmov 8   ;;  %v801_v11 = vpack.c.bf16 %v283_v8, %v275_v7  ;;  %v746_v8 = vld [vmem:[#allocation6 + $0x5] ss:$0 sm:$0xff] }
  0xc4   :  { %912 = vtanh.f32 %v89_v12  ;;  %v280_v12 = vld [vmem:[#allocation8 + $0x240] sm:$0xff]  ;;  %802 = vmatprep.subr.bf16.mxu1 %v801_v11  ;;  %v747_v11 = vld [vmem:[#allocation6 + $0x6] ss:$0 sm:$0xff] }
  0xce   :  { %v1113_v13 = vpop.eup %912 }
  0xcf   :  { %132 = vperm.xlu0 %905, %v1113_v13   ;;  %95 = vperm.xlu1 %902, %v1113_v13  }
  0xd3   :  { %908 = vset.pattern.permute.xlu0 %v1038_v14  ;;  %903 = vset.pattern.permute.xlu1 %v1036_v2  ;;  %v767_v2 = vpack.c.bf16 %v264_v63, %v256_v61  ;;  %v274_v14 = vld [vmem:[#allocation8 + $0x210] sm:$0xff] }
  0xd4   :  { %165 = vperm.xlu0 %908, %v1113_v13   ;;  %110 = vperm.xlu1 %903, %v1113_v13   ;;  %v742_v61 = vld [vmem:[#allocation6 + $0x2] ss:$0 sm:$0xff] }
  0xd5   :  { %768 = vmatpush1.bf16.msra.mxu0 %v767_v2 }
  0xd6   :  { %770 = vmatprep.subr.bf16.mxu0 %v769_v6 }
  0xd8   :  { %911 = vset.pattern.permute.xlu0 %v1039_v15  ;;  %904 = vset.pattern.permute.xlu1 %v1040_v16  ;;  %v282_v15 = vld [vmem:[#allocation8 + $0x250] sm:$0xff]  ;;  %v771_v16 = vpack.c.bf16 %v280_v12, %v272_v9 }
  0xd9   :  { %198 = vperm.xlu0 %911, %v1113_v13   ;;  %121 = vperm.xlu1 %904, %v1113_v13   ;;  %v803_v17 = vpack.c.bf16 %v282_v15, %v274_v14 }
  0xda   :  { %772 = vmatpush1.bf16.msra.mxu0 %v771_v16 }
  0xdb   :  { %804 = vmatpush1.bf16.msra.mxu1 %v803_v17  ;;  %774 = vmatprep.subr.bf16.mxu0 %v773_v21  ;;  %v748_v17 = vld [vmem:[#allocation6 + $0x7] ss:$0 sm:$0xff]  ;;  %v749_v21 = vld [vmem:[#allocation6 + $0x8] ss:$0 sm:$0xff] }
  0xdc   :  { %806 = vmatprep.subr.bf16.mxu1 %v805_v25 }
  0xdd   :  { %906 = vset.pattern.permute.xlu1 %v1041_v28  ;;  %v298_v28 = vld [vmem:[#allocation8 + $0x2d0] sm:$0xff] }
  0xde   :  { %143 = vperm.xlu1 %906, %v1113_v13   ;;  %v807_v29 = vpack.c.bf16 %v298_v28, %v290_v27  ;;  %776 = vmatpush1.bf16.msra.mxu0 %v775_v26 }
  0xe0   :  { %808 = vmatpush1.bf16.msra.mxu1 %v807_v29  ;;  %v751_v29 = vld [vmem:[#allocation6 + $0xa] ss:$0 sm:$0xff] }
  0xe1   :  { %810 = vmatprep.subr.bf16.mxu1 %v809_v36 }
  0xe2   :  { %907 = vset.pattern.permute.xlu1 %v1042_v42  ;;  %v811_v42 = vpack.c.bf16 %v314_v39, %v306_v38  ;;  %v220_v38 = vld [vmem:[#allocation8 + $0x60] sm:$0xff]  ;;  %v214_v39 = vld [vmem:[#allocation8 + $0x30] sm:$0xff] }
  0xe3   :  { %154 = vperm.xlu1 %907, %v1113_v13  }
  0xe4   :  { %812 = vmatpush1.bf16.msra.mxu1 %v811_v42  ;;  %v229_v42 = vld [vmem:[#allocation8 + $0xa8] sm:$0xff] }
  0xe5   :  { %814 = vmatprep.subr.bf16.mxu1 %v813_v47  ;;  %v851_v47 = vpack.c.bf16 %v222_v40, %v214_v39  ;;  %v821_v50 = vpack.c.bf16 %v237_v43, %v229_v42  ;;  %v317_v39 = vld [vmem:[#allocation8 + $0x368] sm:$0xff]  ;;  %v311_v40 = vld [vmem:[#allocation8 + $0x338] sm:$0xff] }
  0xe6   :  { %v319_v42 = vld [vmem:[#allocation8 + $0x378] sm:$0xff] }
  0xe7   :  { %909 = vset.pattern.permute.xlu1 %v1043_v58  ;;  %v223_v58 = vld [vmem:[#allocation8 + $0x78] sm:$0xff] }
  0xe8   :  { %176 = vperm.xlu1 %909, %v1113_v13   ;;  %v849_v59 = vpack.c.bf16 %v223_v58, %v215_v57  ;;  %816 = vmatpush1.bf16.msra.mxu1 %v815_v55  ;;  %v247_v57 = vld [vmem:[#allocation8 + $0x138] sm:$0xff] }
  0xe9   :  { %v255_v58 = vld [vmem:[#allocation8 + $0x178] sm:$0xff] }
  0xea   :  { %850 = vmatprep.subr.bf16.mxu1 %v849_v59  ;;  %v823_v59 = vpack.c.bf16 %v236_v49, %v228_v48  ;;  %v873_v48 = vpack.c.bf16 %v319_v42, %v311_v40  ;;  %v310_v49 = vld [vmem:[#allocation8 + $0x330] sm:$0xff] }
  0xec   :  { %910 = vset.pattern.permute.xlu1 %v1044_v10 }
  0xed   :  { %187 = vperm.xlu1 %910, %v1113_v13   ;;  %v305_v13 = vld [vmem:[#allocation8 + $0x308] sm:$0xff] }
  0xee   :  { %v777_v32 = vpack.c.bf16 %v313_v30, %v305_v13  ;;  %v752_v13 = vld [vmem:[#allocation6 + $0xb] ss:$0 sm:$0xff] }
  0xf0   :  { %778 = vmatprep.subr.bf16.mxu0 %v777_v32 }
  0xf1   :  { %780 = vmatpush1.bf16.msra.mxu0 %v779_v37  ;;  %v212_v37 = vld [vmem:[#allocation8 + $0x20] sm:$0xff] }
  0xf2   :  { %782 = vmatprep.subr.bf16.mxu0 %v781_v46  ;;  %v819_v46 = vpack.c.bf16 %v220_v38, %v212_v37  ;;  %v302_v37 = vld [vmem:[#allocation8 + $0x2f0] sm:$0xff]  ;;  %v309_v38 = vld [vmem:[#allocation8 + $0x328] sm:$0xff] }
  0xf5   :  { %784 = vmatpush1.bf16.msra.mxu0 %v783_v51  ;;  %v853_v51 = vpack.c.bf16 %v239_v45, %v231_v44  ;;  %v308_v45 = vld [vmem:[#allocation8 + $0x320] sm:$0xff] }
  0xf6   :  { %818 = vmatprep.subr.bf16.mxu0 %v817_v56  ;;  %v253_v56 = vld [vmem:[#allocation8 + $0x168] sm:$0xff] }
 0x14e   :  { %v96_v60 = vpop.permute.xlu1 %95  ;;  %v133_v9 = vpop.permute.xlu0 %132 }
 0x14f   :  { %v102_v63 = vmul.f32 %v742_v61, %v96_v60  ;;  %v139_v12 = vmul.f32 %v746_v8, %v133_v9  ;;  %v855_v60 = vpack.c.bf16 %v238_v53, %v230_v52  ;;  %v244_v61 = vld [vmem:[#allocation8 + $0x120] sm:$0xff]  ;;  %v333_v52 = vld [vmem:[#allocation8 + $0x3e8] sm:$0xff]  ;;  %v327_v53 = vld [vmem:[#allocation8 + $0x3b8] sm:$0xff] }
 0x150   :  { %v260_v9 = vld [vmem:[#allocation8 + $0x1a0] sm:$0xff] }
 0x151   :  { %v107_v4 = vadd.f32 %v743_v1, %v102_v63  ;;  %v825_v63 = vpack.c.bf16 %v253_v56, %v245_v54  ;;  %v246_v1 = vld [vmem:[#allocation8 + $0x130] sm:$0xff]  ;;  %v335_v54 = vld [vmem:[#allocation8 + $0x3f8] sm:$0xff] }
 0x153   :  { %v111_v0 = vpop.permute.xlu1 %110  ;;  %v166_v22 = vpop.permute.xlu0 %165 }
 0x154   :  { %v117_v2 = vmul.f32 %v744_v62, %v111_v0  ;;  %v172_v25 = vmul.f32 %v749_v21, %v166_v22  ;;  %v252_v62 = vld [vmem:[#allocation8 + $0x160] sm:$0xff]  ;;  %v857_v0 = vpack.c.bf16 %v255_v58, %v247_v57 }
 0x155   :  { %v276_v21 = vld [vmem:[#allocation8 + $0x220] sm:$0xff] }
 0x156   :  { %v118_v6 = vadd.f32 %v117_v2, %v107_v4  ;;  %v254_v2 = vld [vmem:[#allocation8 + $0x170] sm:$0xff]  ;;  %v269_v4 = vld [vmem:[#allocation8 + $0x1e8] sm:$0xff]  ;;  %v284_v22 = vld [vmem:[#allocation8 + $0x260] sm:$0xff] }
 0x157   :  { %v859_v8 = vpack.c.bf16 %v254_v2, %v246_v1  ;;  %v324_v58 = vld [vmem:[#allocation8 + $0x3a0] sm:$0xff] }
 0x158   :  { %v122_v5 = vpop.permute.xlu1 %121  ;;  %v199_v30 = vpop.permute.xlu0 %198 }
 0x159   :  { %v128_v7 = vmul.f32 %v745_v3, %v122_v5  ;;  %v205_v34 = vmul.f32 %v752_v13, %v199_v30  ;;  %v261_v3 = vld [vmem:[#allocation8 + $0x1a8] sm:$0xff]  ;;  %v263_v5 = vld [vmem:[#allocation8 + $0x1b8] sm:$0xff]  ;;  %v835_v30 = vpack.c.bf16 %v284_v22, %v276_v21 }
 0x15a   :  { %v303_v13 = vld [vmem:[#allocation8 + $0x2f8] sm:$0xff] }
 0x15b   :  { %v129_v10 = vadd.f32 %v128_v7, %v118_v6  ;;  %v271_v6 = vld [vmem:[#allocation8 + $0x1f8] sm:$0xff]  ;;  %v827_v7 = vpack.c.bf16 %v252_v62, %v244_v61  ;;  %v332_v61 = vld [vmem:[#allocation8 + $0x3e0] sm:$0xff]  ;;  %v326_v62 = vld [vmem:[#allocation8 + $0x3b0] sm:$0xff] }
 0x15d   :  { %v144_v14 = vpop.permute.xlu1 %143  ;;  %v140_v15 = vadd.f32 %v139_v12, %v129_v10  ;;  %v268_v10 = vld [vmem:[#allocation8 + $0x1e0] sm:$0xff]  ;;  %v861_v12 = vpack.c.bf16 %v271_v6, %v263_v5  ;;  %v338_v6 = vlaneseq }
 0x15e   :  { %v150_v16 = vmul.f32 %v747_v11, %v144_v14  ;;  %v829_v11 = vpack.c.bf16 %v269_v4, %v261_v3  ;;  %v262_v14 = vld [vmem:[#allocation8 + $0x1b0] sm:$0xff] }
 0x160   :  { %v151_v19 = vadd.f32 %v150_v16, %v140_v15  ;;  %v270_v15 = vld [vmem:[#allocation8 + $0x1f0] sm:$0xff]  ;;  %v277_v16 = vld [vmem:[#allocation8 + $0x228] sm:$0xff] }
 0x162   :  { %v155_v18 = vpop.permute.xlu1 %154 }
 0x163   :  { %v161_v20 = vmul.f32 %v748_v17, %v155_v18  ;;  %v285_v17 = vld [vmem:[#allocation8 + $0x268] sm:$0xff]  ;;  %v279_v18 = vld [vmem:[#allocation8 + $0x238] sm:$0xff] }
 0x165   :  { %v162_v23 = vadd.f32 %v161_v20, %v151_v19  ;;  %v287_v19 = vld [vmem:[#allocation8 + $0x278] sm:$0xff]  ;;  %v831_v20 = vpack.c.bf16 %v268_v10, %v260_v9 }
 0x167   :  { %v177_v26 = vpop.permute.xlu1 %176  ;;  %v173_v27 = vadd.f32 %v172_v25, %v162_v23  ;;  %v833_v23 = vpack.c.bf16 %v285_v17, %v277_v16  ;;  %v278_v25 = vld [vmem:[#allocation8 + $0x230] sm:$0xff] }
 0x168   :  { %v183_v28 = vmul.f32 %v750_v24, %v177_v26  ;;  %v865_v24 = vpack.c.bf16 %v287_v19, %v279_v18  ;;  %v286_v26 = vld [vmem:[#allocation8 + $0x270] sm:$0xff] }
 0x16a   :  { %v184_v32 = vadd.f32 %v183_v28, %v173_v27  ;;  %v293_v27 = vld [vmem:[#allocation8 + $0x2a8] sm:$0xff] }
 0x16b   :  { %v301_v28 = vld [vmem:[#allocation8 + $0x2e8] sm:$0xff] }
 0x16c   :  { %v188_v31 = vpop.permute.xlu1 %187 }
 0x16d   :  { %v194_v33 = vmul.f32 %v751_v29, %v188_v31  ;;  %v295_v29 = vld [vmem:[#allocation8 + $0x2b8] sm:$0xff]  ;;  %v867_v31 = vpack.c.bf16 %v286_v26, %v278_v25 }
 0x16f   :  { %v195_v35 = vadd.f32 %v194_v33, %v184_v32  ;;  %v292_v32 = vld [vmem:[#allocation8 + $0x2a0] sm:$0xff] }
 0x170   :  { %v300_v33 = vld [vmem:[#allocation8 + $0x2e0] sm:$0xff] }
 0x171   :  { %v206_v36 = vadd.f32 %v205_v34, %v195_v35  ;;  %v837_v34 = vpack.c.bf16 %v301_v28, %v293_v27  ;;  %v869_v35 = vpack.c.bf16 %v303_v13, %v295_v29  ;;  %v839_v43 = vpack.c.bf16 %v300_v33, %v292_v32 }
 0x173   :  { %914 = vtanh.f32 %v206_v36  ;;  %v294_v36 = vld [vmem:[#allocation8 + $0x2b0] sm:$0xff] }
 0x174   :  { %v871_v44 = vpack.c.bf16 %v302_v37, %v294_v36 }
 0x17d   :  { %v1127_v55 = vpop.eup %914 }
 0x17e   :  { %443 = vmatmul.mubr.f32.vlgmr.msra.gmra.mrb[0].mxu0 %v1127_v55  ;;  %514 = vmatmul.mubr.f32.vlgmr.msra.gmra.mrb[0].mxu1 %v1127_v55 }
 0x17f   :  { %820 = vmatpush1.bf16.msra.mxu0 %v819_v46  ;;  %852 = vmatpush1.bf16.msra.mxu1 %v851_v47  ;;  %v316_v46 = vld [vmem:[#allocation8 + $0x360] sm:$0xff]  ;;  %v841_v47 = vpack.c.bf16 %v317_v39, %v309_v38 }
 0x180   :  { %822 = vmatprep.subr.bf16.mxu0 %v821_v50  ;;  %854 = vmatprep.subr.bf16.mxu1 %v853_v51  ;;  %v318_v50 = vld [vmem:[#allocation8 + $0x370] sm:$0xff]  ;;  %v325_v51 = vld [vmem:[#allocation8 + $0x3a8] sm:$0xff]  ;;  %v843_v56 = vpack.c.bf16 %v316_v46, %v308_v45 }
 0x181   :  { %584 = vmatprep.mubr.f32.mxu0 %v1045_v41  ;;  %655 = vmatprep.mubr.f32.mxu1 %v1045_v41  ;;  %v863_v41 = vpack.c.bf16 %v270_v15, %v262_v14  ;;  %v875_v57 = vpack.c.bf16 %v318_v50, %v310_v49 }
 0x183   :  { %824 = vmatpush1.bf16.msra.mxu0 %v823_v59  ;;  %856 = vmatpush1.bf16.msra.mxu1 %v855_v60  ;;  %v845_v59 = vpack.c.bf16 %v333_v52, %v325_v51  ;;  %v877_v60 = vpack.c.bf16 %v335_v54, %v327_v53 }
 0x184   :  { %826 = vmatprep.subr.bf16.mxu0 %v825_v63  ;;  %858 = vmatprep.subr.bf16.mxu1 %v857_v0  ;;  %v334_v63 = vld [vmem:[#allocation8 + $0x3f0] sm:$0xff]  ;;  %v847_v0 = vpack.c.bf16 %v332_v61, %v324_v58 }
 0x185   :  { %v879_v1 = vpack.c.bf16 %v334_v63, %v326_v62 }
 0x187   :  { %828 = vmatpush1.bf16.msra.mxu0 %v827_v7  ;;  %860 = vmatpush1.bf16.msra.mxu1 %v859_v8  ;;  %v339_v7 = vshrl.u32 %v338_v6, 7 }
 0x188   :  { %830 = vmatprep.subr.bf16.mxu0 %v829_v11  ;;  %862 = vmatprep.subr.bf16.mxu1 %v861_v12  ;;  %v336_v12 = vld [vmem:[%s1194_s4] sm:$0xff]  ;;  %s1046_s4 = smov [#allocation9]  }
 0x189   :  { %v340_v8 = vsub.s32 0, %v339_v7  ;;  %v348_v9 = vsub.s32 2, %v339_v7  ;;  %v356_v10 = vsub.s32 4, %v339_v7  ;;  %v364_v11 = vsub.s32 6, %v339_v7  ;;  %s729_s30 = sshll.u32 %s1046_s4, 4  ;;  %s730_s30 = int_to_ptr.vmem [resolvable:$true] %s729_s30 }
 0x18a   :  { %v344_v14 = vsub.s32 1, %v339_v7  ;;  %v352_v15 = vsub.s32 3, %v339_v7  ;;  %v360_v16 = vsub.s32 5, %v339_v7  ;;  %v368_v17 = vsub.s32 7, %v339_v7  ;;  %s1000_s6 = scalar_lea.vmem %s730_s30, 1024  ;;  %p1005_p11 = scmp.lt.s32.totalorder %s730_s30, %s730_s30 }
 0x18b   :  { %832 = vmatpush1.bf16.msra.mxu0 %v831_v20  ;;  %864 = vmatpush1.bf16.msra.mxu1 %v863_v41  ;;  %v341_v18 = vrot.slane %v336_v12, %v340_v8  ;;  %v357_v19 = vrot.slane %v336_v12, %v356_v10  ;;  %v365_v20 = vrot.slane %v336_v12, %v364_v11  ;;  %p1001_p10 = scmp.ne.s32.totalorder %s730_s30, %s1000_s6  ;;  %p1006_p12 = scmp.lt.s32.totalorder %s1000_s6, %s1000_s6 }
 0x18c   :  { %834 = vmatprep.subr.bf16.mxu0 %v833_v23  ;;  %866 = vmatprep.subr.bf16.mxu1 %v865_v24  ;;  %v345_v41 = vrot.slane %v336_v12, %v344_v14  ;;  %v353_v21 = vrot.slane %v336_v12, %v352_v15  ;;  %v361_v22 = vrot.slane %v336_v12, %v360_v16 }
 0x18d   :  { %v369_v23 = vrot.slane %v336_v12, %v368_v17  ;;  %p1007_p13 = por %p1006_p12, %p1005_p11 }
 0x18f   :  { %836 = vmatpush1.bf16.msra.mxu0 %v835_v30  ;;  %868 = vmatpush1.bf16.msra.mxu1 %v867_v31  ;;  %p1008_p0 = pnand %p1007_p13, %p1001_p10 }
 0x190   :  { %838 = vmatprep.subr.bf16.mxu0 %v837_v34  ;;  %870 = vmatprep.subr.bf16.mxu1 %v869_v35 }
 0x193   :  { %840 = vmatpush1.bf16.msra.mxu0 %v839_v43  ;;  %872 = vmatpush1.bf16.msra.mxu1 %v871_v44 }
 0x194   :  { %842 = vmatprep.subr.bf16.mxu0 %v841_v47  ;;  %874 = vmatprep.subr.bf16.mxu1 %v873_v48 }
 0x197   :  { %844 = vmatpush1.bf16.msra.mxu0 %v843_v56  ;;  %876 = vmatpush1.bf16.msra.mxu1 %v875_v57 }
 0x198   :  { %846 = vmatprep.subr.bf16.mxu0 %v845_v59  ;;  %878 = vmatprep.subr.bf16.mxu1 %v877_v60 }
 0x19b   :  { %848 = vmatpush1.bf16.msra.mxu0 %v847_v0  ;;  %880 = vmatpush1.bf16.msra.mxu1 %v879_v1 }
 0x19e   :  { %585 = vmatmul.mubr.f32.vlgmr.msra.gmra.mrb[2].mxu0 %v1127_v55  ;;  %656 = vmatmul.mubr.f32.vlgmr.msra.gmra.mrb[2].mxu1 %v1127_v55  ;;  %v349_v55 = vrot.slane %v336_v12, %v348_v9 }
 0x251   :  { %v444_v2 = vpop.f32.mrb[0].mxu0  ;;  %v515_v3 = vpop.f32.mrb[0].mxu1 }
 0x252   :  { %v446_v4 = vpop.f32.mrb[1].mxu0  ;;  %v517_v5 = vpop.f32.mrb[1].mxu1  ;;  %v1138_v26 = vadd.f32 %v444_v2, %v341_v18  ;;  %v1140_v27 = vadd.f32 %v515_v3, %v349_v55 }
 0x253   :  { %v1146_v31 = vadd.f32 %v446_v4, %v345_v41  ;;  %v1148_v32 = vadd.f32 %v517_v5, %v353_v21 }
 0x271   :  { %v586_v24 = vpop.f32.mrb[2].mxu0  ;;  %v657_v25 = vpop.f32.mrb[2].mxu1 }
 0x272   :  { %v1142_v28 = vadd.f32 %v586_v24, %v357_v19  ;;  %v1144_v29 = vadd.f32 %v657_v25, %v365_v20  ;;  %v588_v13 = vpop.f32.mrb[3].mxu0  ;;  %v659_v30 = vpop.f32.mrb[3].mxu1 }
 0x273   :  { %v1150_v33 = vadd.f32 %v588_v13, %v361_v22  ;;  %v1152_v34 = vadd.f32 %v659_v30, %v369_v23 }
 0x274   :  { %v662_v35 = vmax.f32 %v1138_v26, %v1142_v28  ;;  %v664_v36 = vmax.f32 %v1140_v27, %v1144_v29 }
 0x275   :  { %v663_v37 = vmax.f32 %v1146_v31, %v1150_v33  ;;  %v665_v38 = vmax.f32 %v1148_v32, %v1152_v34 }
 0x277   :  { %v666_v39 = vmax.f32 %v662_v35, %v663_v37  ;;  %v667_v40 = vmax.f32 %v664_v36, %v665_v38 }
 0x279   :  { %v668_v42 = vmax.f32 %v666_v39, %v667_v40 }
 0x27b   :  { %669 = vmax.xlane.f32.xlu1 %v668_v42 }
 0x308   :  { %v670_v43 = vpop.xlane.xlu1 %669 }
 0x309   :  { %v671_v44 = vsub.f32 %v1138_v26, %v670_v43  ;;  %v672_v45 = vsub.f32 %v1146_v31, %v670_v43  ;;  %v673_v46 = vsub.f32 %v1140_v27, %v670_v43  ;;  %v674_v47 = vsub.f32 %v1148_v32, %v670_v43 }
 0x30a   :  { %v675_v51 = vsub.f32 %v1142_v28, %v670_v43  ;;  %v676_v53 = vsub.f32 %v1150_v33, %v670_v43  ;;  %v677_v54 = vsub.f32 %v1144_v29, %v670_v43  ;;  %v678_v57 = vsub.f32 %v1152_v34, %v670_v43 }
 0x30b   :  { %v679_v48 = vmul.f32 1.442695, %v671_v44  ;;  %v681_v49 = vmul.f32 1.442695, %v672_v45  ;;  %v683_v50 = vmul.f32 1.442695, %v673_v46 }
 0x30c   :  { %v685_v52 = vmul.f32 1.442695, %v674_v47  ;;  %v687_v56 = vmul.f32 1.442695, %v675_v51  ;;  %v689_v58 = vmul.f32 1.442695, %v676_v53 }
 0x30d   :  { %916 = vpow2.f32 %v679_v48  ;;  %v691_v59 = vmul.f32 1.442695, %v677_v54  ;;  %v693_v60 = vmul.f32 1.442695, %v678_v57 }
 0x30e   :  { %918 = vpow2.f32 %v681_v49 }
 0x30f   :  { %920 = vpow2.f32 %v683_v50 }
 0x310   :  { %922 = vpow2.f32 %v685_v52 }
 0x311   :  { %924 = vpow2.f32 %v687_v56 }
 0x312   :  { %926 = vpow2.f32 %v689_v58 }
 0x313   :  { %928 = vpow2.f32 %v691_v59 }
 0x314   :  { %930 = vpow2.f32 %v693_v60 }
 0x317   :  { %v917_v61 = vpop.eup %916 }
 0x318   :  { %v919_v62 = vpop.eup %918 }
 0x319   :  { %v695_v63 = vadd.f32 %v919_v62, %v917_v61  ;;  %v921_v0 = vpop.eup %920 }
 0x31a   :  { %v923_v2 = vpop.eup %922 }
 0x31b   :  { %v696_v1 = vadd.f32 %v921_v0, %v695_v63  ;;  %v925_v4 = vpop.eup %924 }
 0x31c   :  { %v927_v6 = vpop.eup %926 }
 0x31d   :  { %v697_v3 = vadd.f32 %v923_v2, %v696_v1  ;;  %v929_v8 = vpop.eup %928 }
 0x31e   :  { %v931_v10 = vpop.eup %930 }
 0x31f   :  { %v698_v5 = vadd.f32 %v925_v4, %v697_v3 }
 0x321   :  { %v699_v7 = vadd.f32 %v927_v6, %v698_v5 }
 0x323   :  { %v700_v9 = vadd.f32 %v929_v8, %v699_v7 }
 0x325   :  { %v701_v11 = vadd.f32 %v931_v10, %v700_v9 }
 0x327   :  { %702 = vadd.xlane.f32.xlu0 %v701_v11 }
 0x3b4   :  { %v703_v12 = vpop.xlane.xlu0 %702 }
 0x3b5   :  { %932 = vlog2.f32 %v703_v12 }
 0x3bf   :  { %v933_v14 = vpop.eup %932 }
 0x3c0   :  { %v705_v15 = vmul.f32 0.6931472, %v933_v14 }
 0x3c2   :  { %v706_v16 = vadd.f32 %v705_v15, %v670_v43 }
 0x3c4   :  { %v707_v17 = vsub.f32 %v1138_v26, %v706_v16  ;;  %v708_v18 = vsub.f32 %v1146_v31, %v706_v16  ;;  %v709_v55 = vsub.f32 %v1140_v27, %v706_v16  ;;  %v710_v19 = vsub.f32 %v1148_v32, %v706_v16 }
 0x3c5   :  { %v711_v20 = vsub.f32 %v1142_v28, %v706_v16  ;;  %v712_v41 = vsub.f32 %v1150_v33, %v706_v16  ;;  %v713_v21 = vsub.f32 %v1144_v29, %v706_v16  ;;  %v714_v22 = vsub.f32 %v1152_v34, %v706_v16 }
 0x3c6   :  { %715 = vst [vmem:[#allocation9] sm:$0xff] %v707_v17  ;;  %716 = vst [vmem:[#allocation9 + $0x8] sm:$0xff] %v708_v18 }
 0x3c7   :  { %717 = vst [vmem:[#allocation9 + $0x10] sm:$0xff] %v709_v55  ;;  %718 = vst [vmem:[#allocation9 + $0x18] sm:$0xff] %v710_v19 }
 0x3c8   :  { %719 = vst [vmem:[#allocation9 + $0x20] sm:$0xff] %v711_v20  ;;  %720 = vst [vmem:[#allocation9 + $0x28] sm:$0xff] %v712_v41 }
 0x3c9   :  { %721 = vst [vmem:[#allocation9 + $0x30] sm:$0xff] %v713_v21  ;;  %722 = vst [vmem:[#allocation9 + $0x38] sm:$0xff] %v714_v22 }
 0x3ca   :  { %1011 = shalt.err (!%p1008_p0)
}
 0x3cb   :  { %s1012_s9 = scalar_lea.hbm %s1195_s5, 1024 }
 0x3cc   :  { %p1013_p1 = scmp.ne.s32.totalorder %s1195_s5, %s1012_s9  ;;  %p1016_p2 = scmp.lt.u32.totalorder %s1012_s9, %s1195_s5 }
 0x3ce   :  { %p1018_p3 = pnand %p1016_p2, %p1013_p1 }
 0x3d0   :  { %1021 = shalt.err (!%p1018_p3)
}
 0x3d1   :  { %732 = dma.vmem_to_hbm [thread:$0]  %s730_s30, 1024, %s1195_s5, [#allocation5]  }
 0x3d2   :  { %1026 = dma.done.wait [#allocation5], 1024  }
 0x3d3   :  { %1027 = vsyncadd [#allocation5], 4294966272 }
 0x3d4   :  { %736 = vsyncpa [#allocation4], 1 }
 0x3d5   :  { %737 = vsyncpa [#allocation7], 1 }
 0x3d6   :  { %738 = vsyncpa [#allocation5], 1 }

</bundles_post_ra>
